<compile_context>
chip_gen: v7x
topology: tpu7x:2x2x1
jax: 0.10.0
libtpu: 0.0.40
codegen_flags: <defaults>
</compile_context>

<pallas_src>
import math

import jax
import jax.numpy as jnp
from jax import lax
from jax.experimental import pallas as pl
from jax.experimental.pallas import tpu as pltpu


def _tile(dim, target, quantum):
    """Largest multiple of `quantum` that divides `dim` and is <= `target`;
    falls back to the full dim (always a legal block size).
    TODO(synk): for awkward dims with no 8/128-quantized divisor, pad to a
    multiple (or use a cdiv grid with an in-kernel tail mask) instead of
    falling back to the full dimension."""
    if dim <= target:
        return dim
    t = (target // quantum) * quantum
    while t >= quantum:
        if dim % t == 0:
            return t
        t -= quantum
    return dim


# ----------------------------------------------------------------------------
# Kernel 1: tiled dense linear  y = x @ W + b   (bf16 MXU operands, f32 accum)
# ----------------------------------------------------------------------------
def _linear_kernel(x_ref, w_ref, b_ref, o_ref, acc_ref):
    k = pl.program_id(2)

    @pl.when(k == 0)
    def _():
        acc_ref[...] = jnp.zeros_like(acc_ref)

    a = x_ref[...]
    w = w_ref[...]
    if a.dtype == jnp.float32:     # bf16 MXU rate; accumulation stays f32
        a = a.astype(jnp.bfloat16)
        w = w.astype(jnp.bfloat16)
    acc_ref[...] += jnp.dot(a, w, preferred_element_type=jnp.float32)

    @pl.when(k == pl.num_programs(2) - 1)
    def _():
        o_ref[...] = (acc_ref[...] + b_ref[...].astype(jnp.float32)
                      ).astype(o_ref.dtype)


def linear(x, w, b):
    """x: (M, K), w: (K, N), b: (1, N) -> (M, N)."""
    M, K = x.shape
    _, N = w.shape
    tm = _tile(M, 512, 8)
    tn = _tile(N, 512, 128)
    tk = _tile(K, 1024, 128)

    cost = pl.CostEstimate(
        flops=2 * M * N * K,
        transcendentals=0,
        bytes_accessed=(M * K + K * N + N + M * N) * x.dtype.itemsize,
    )
    return pl.pallas_call(
        _linear_kernel,
        out_shape=jax.ShapeDtypeStruct((M, N), x.dtype),
        grid_spec=pltpu.PrefetchScalarGridSpec(
            num_scalar_prefetch=0,
            grid=(M // tm, N // tn, K // tk),
            in_specs=[
                pl.BlockSpec((tm, tk), lambda i, j, k: (i, k)),
                pl.BlockSpec((tk, tn), lambda i, j, k: (k, j)),
                pl.BlockSpec((1, tn), lambda i, j, k: (0, j)),
            ],
            out_specs=pl.BlockSpec((tm, tn), lambda i, j, k: (i, j)),
            scratch_shapes=[pltpu.VMEM((tm, tn), jnp.float32)],
        ),
        compiler_params=pltpu.CompilerParams(
            dimension_semantics=("parallel", "parallel", "arbitrary")),
        cost_estimate=cost,
    )(x, w, b)


# ----------------------------------------------------------------------------
# Kernel 2: fused multi-head attention on channel-blocked views of (B, T, 3C) qkv
#   per head: att = softmax(q k^T / sqrt(hd)); att = relu(att - thr); y = att @ v
# ----------------------------------------------------------------------------
def _make_attn_kernel(n_head, head_dim, scale, threshold):
    def kernel(q_ref, k_ref, v_ref, o_ref):
        # q_ref: (1, tq, C)  query tile          (channel block 0 of qkv)
        # k_ref: (1, T,  C)  keys, resident      (channel block 1 of qkv)
        # v_ref: (1, T,  C)  values, resident    (channel block 2 of qkv)
        # o_ref: (1, tq, C)  lane-dense output block
        q = q_ref[0].astype(jnp.bfloat16)   # (tq, C)
        k = k_ref[0].astype(jnp.bfloat16)   # (T,  C)
        v = v_ref[0].astype(jnp.bfloat16)   # (T,  C)

        ys = []
        # Unrolled head loop (n_head is small here).
        # TODO(synk): for very long T / large n_head, switch to a flash-style kv grid
        # axis with online softmax (needs T_Threshold == 0 or a two-pass scheme,
        # because relu(softmax - thr) depends on the final normalizer).
        for h in range(n_head):
            lo = h * head_dim
            q_h = q[:, lo:lo + head_dim]                   # (tq, hd)
            k_h = k[:, lo:lo + head_dim]                   # (T,  hd)
            v_h = v[:, lo:lo + head_dim]                   # (T,  hd)

            # scores: contract last dims directly (no explicit k.T relayout)
            att = lax.dot_general(
                q_h, k_h, (((1,), (1,)), ((), ())),
                preferred_element_type=jnp.float32) * scale    # (tq, T) f32

            # numerically-stable softmax over keys
            m = jnp.max(att, axis=-1, keepdims=True)
            e = jnp.exp(att - m)
            denom = jnp.sum(e, axis=-1, keepdims=True)
            p = e * pl.reciprocal(denom, approx=True)
            # relu(att - T_Threshold); attn_dropout / AttentionMap are identity (eval)
            p = jnp.maximum(p - threshold, 0.0)

            ys.append(jnp.dot(p.astype(jnp.bfloat16), v_h,
                              preferred_element_type=jnp.float32))  # (tq, hd) f32

        # one lane-dense (tq, C) store instead of n_head masked sub-128-lane stores
        o_ref[0] = jnp.concatenate(ys, axis=-1).astype(o_ref.dtype)

    return kernel


def attention(qkv, n_head, threshold):
    """qkv: (B, T, 3C) -> y: (B, T, C); heads split/merged inside the kernel."""
    B, T, C3 = qkv.shape
    C = C3 // 3
    hd = C // n_head
    # Channel-blocked q/k/v BlockSpecs require a 128-aligned embedding width.
    # TODO(synk): for C % 128 != 0, fall back to a single (1, T, 3C) kv view.
    assert C % 128 == 0, "attention kernel requires n_embd % 128 == 0"
    scale = 1.0 / math.sqrt(hd)
    tq = _tile(T, 512, 8)

    cost = pl.CostEstimate(
        flops=4 * B * n_head * T * T * hd,
        transcendentals=B * n_head * T * T,
        bytes_accessed=4 * B * T * C * qkv.dtype.itemsize,
    )
    return pl.pallas_call(
        _make_attn_kernel(n_head, hd, scale, float(threshold)),
        out_shape=jax.ShapeDtypeStruct((B, T, C), qkv.dtype),
        grid_spec=pltpu.PrefetchScalarGridSpec(
            num_scalar_prefetch=0,
            grid=(B, T // tq),
            in_specs=[
                # qkv passed three times; the channel axis is blocked so only the
                # needed C-wide stripes are DMA'd (q tile + resident k/v views).
                pl.BlockSpec((1, tq, C), lambda b, qi: (b, qi, 0)),
                pl.BlockSpec((1, T, C), lambda b, qi: (b, 0, 1)),
                pl.BlockSpec((1, T, C), lambda b, qi: (b, 0, 2)),
            ],
            out_specs=pl.BlockSpec((1, tq, C), lambda b, qi: (b, qi, 0)),
        ),
        compiler_params=pltpu.CompilerParams(
            dimension_semantics=("parallel", "parallel")),
        cost_estimate=cost,
    )(qkv, qkv, qkv)


# ----------------------------------------------------------------------------
# Full forward pass (reshapes are free row-major views; no HBM transposes)
# ----------------------------------------------------------------------------
def multihead_self_attention(x, params, n_head, t_threshold=0.0):
    B, T, C = x.shape

    qkv = linear(x.reshape(B * T, C), params["w_attn"], params["b_attn"])  # (B*T, 3C)
    qkv = qkv.reshape(B, T, 3 * C)

    y = attention(qkv, n_head, t_threshold)                                # (B, T, C)

    # c_proj; resid_dropout is identity (eval mode)
    y = linear(y.reshape(B * T, C), params["w_proj"], params["b_proj"])    # (B*T, C)
    return y.reshape(B, T, C)


# ----------------------------------------------------------------------------
# Pure-JAX (f32) reference for validation
# ----------------------------------------------------------------------------
def reference(x, params, n_head, t_threshold=0.0):
    B, T, C = x.shape
    hd = C // n_head
    qkv = x.reshape(B * T, C) @ params["w_attn"] + params["b_attn"]
    qkv = qkv.reshape(B, T, 3 * C)
    q, k, v = jnp.split(qkv, 3, axis=2)
    q = q.reshape(B, T, n_head, hd).transpose(0, 2, 1, 3)
    k = k.reshape(B, T, n_head, hd).transpose(0, 2, 1, 3)
    v = v.reshape(B, T, n_head, hd).transpose(0, 2, 1, 3)
    att = jnp.einsum("bhqd,bhkd->bhqk", q, k) / math.sqrt(hd)
    att = jax.nn.softmax(att, axis=-1)
    att = jnp.maximum(att - t_threshold, 0.0)
    y = jnp.einsum("bhqk,bhkd->bhqd", att, v)
    y = y.transpose(0, 2, 1, 3).reshape(B * T, C)
    y = y @ params["w_proj"] + params["b_proj"]
    return y.reshape(B, T, C)


if __name__ == "__main__":
    # Small shapes consistent with the module: block_size=T=8, n_head=4.
    # n_embd=128 (smallest lane-aligned embedding; the channel-split attention
    # specs require n_embd % 128 == 0).
    B, T, C, n_head = 2, 8, 128, 4
    T_Threshold = 0.05

    key = jax.random.PRNGKey(0)
    k_x, k_wa, k_ba, k_wp, k_bp = jax.random.split(key, 5)

    x = jax.random.normal(k_x, (B, T, C), dtype=jnp.float32)
    params = {
        # weights stored as (in, out); bias kept 2D (1, out) for TPU-friendly layout
        "w_attn": jax.random.normal(k_wa, (C, 3 * C), dtype=jnp.float32) * 0.02,
        "b_attn": jax.random.normal(k_ba, (1, 3 * C), dtype=jnp.float32) * 0.02,
        "w_proj": jax.random.normal(k_wp, (C, C), dtype=jnp.float32) * 0.02,
        "b_proj": jax.random.normal(k_bp, (1, C), dtype=jnp.float32) * 0.02,
    }

    out = multihead_self_attention(x, params, n_head, T_Threshold)
    out = jax.block_until_ready(out)

    ref = reference(x, params, n_head, T_Threshold)
    assert out.shape == (B, T, C)
    # Tolerance loosened vs the pure-f32 version because MXU operands are bf16
    # (accumulation stays f32); see perf review.
    err = float(jnp.max(jnp.abs(out - ref)))
    assert jnp.allclose(out, ref, atol=2e-3, rtol=2e-2), f"mismatch vs reference (max abs err {err})"

    print("KERNEL_OK")
</pallas_src>

<mosaic_0001>
module attributes {stable_mosaic.version = 11 : i64} {
  func.func @_linear_kernel(%arg0: i32, %arg1: i32, %arg2: i32, %arg3: memref<16x128xf32, #tpu.memory_space<vmem>>, %arg4: memref<128x384xf32, #tpu.memory_space<vmem>>, %arg5: memref<1x384xf32, #tpu.memory_space<vmem>>, %arg6: memref<16x384xf32, #tpu.memory_space<vmem>>, %arg7: memref<16x384xf32, #tpu.memory_space<vmem>>) attributes {dimension_semantics = [#tpu.dimension_semantics<parallel>, #tpu.dimension_semantics<parallel>, #tpu.dimension_semantics<arbitrary>], iteration_bounds = array<i64: 1, 1, 1>, scalar_prefetch = 0 : i64, scratch_operands = 1 : i64, tpu.core_type = #tpu.core_type<tc>, window_params = [{transform_indices = @transform_0, window_bounds = array<i64: 16, 128>}, {transform_indices = @transform_1, window_bounds = array<i64: 128, 384>}, {transform_indices = @transform_2, window_bounds = array<i64: 1, 384>}, {transform_indices = @transform_3, window_bounds = array<i64: 16, 384>}]} {
    %c0_i32 = arith.constant 0 : i32
    %0 = arith.cmpi eq, %arg2, %c0_i32 : i32
    %1 = arith.extui %0 : i1 to i32
    %c0_i32_0 = arith.constant 0 : i32
    %2 = arith.cmpi ne, %1, %c0_i32_0 : i32
    scf.if %2 {
      %cst_10 = arith.constant 0.000000e+00 : f32
      %14 = vector.broadcast %cst_10 : f32 to vector<16x384xf32>
      %c0_11 = arith.constant 0 : index
      %c0_12 = arith.constant 0 : index
      %15 = vector.load %arg7[%c0_11, %c0_12] : memref<16x384xf32, #tpu.memory_space<vmem>>, vector<16x384xf32>
      tpu.vector_store %arg7[%c0_11, %c0_12], %14 {strides = array<i32>} : memref<16x384xf32, #tpu.memory_space<vmem>>, vector<16x384xf32>,
    } else {
    }
    %c0 = arith.constant 0 : index
    %c0_1 = arith.constant 0 : index
    %3 = vector.load %arg3[%c0, %c0_1] : memref<16x128xf32, #tpu.memory_space<vmem>>, vector<16x128xf32>
    %c0_2 = arith.constant 0 : index
    %c0_3 = arith.constant 0 : index
    %4 = vector.load %arg4[%c0_2, %c0_3] : memref<128x384xf32, #tpu.memory_space<vmem>>, vector<128x384xf32>
    %5 = arith.truncf %3 : vector<16x128xf32> to vector<16x128xbf16>
    %6 = arith.truncf %4 : vector<128x384xf32> to vector<128x384xbf16>
    %c0_4 = arith.constant 0 : index
    %c0_5 = arith.constant 0 : index
    %7 = vector.load %arg7[%c0_4, %c0_5] : memref<16x384xf32, #tpu.memory_space<vmem>>, vector<16x384xf32>
    %cst = arith.constant dense<0.000000e+00> : vector<16x384xf32>
    %8 = tpu.matmul %5, %6, %cst {dimension_numbers = #tpu.dot_dimension_numbers<[1], [0], [0], [1], [0, 0, 1, 1], [], []>} : vector<16x128xbf16>, vector<128x384xbf16>, vector<16x384xf32> -> vector<16x384xf32>
    %9 = arith.addf %7, %8 : vector<16x384xf32>
    %c0_6 = arith.constant 0 : index
    %c0_7 = arith.constant 0 : index
    %10 = vector.load %arg7[%c0_6, %c0_7] : memref<16x384xf32, #tpu.memory_space<vmem>>, vector<16x384xf32>
    tpu.vector_store %arg7[%c0_6, %c0_7], %9 {strides = array<i32>} : memref<16x384xf32, #tpu.memory_space<vmem>>, vector<16x384xf32>,
    %c0_i32_8 = arith.constant 0 : i32
    %11 = arith.cmpi eq, %arg2, %c0_i32_8 : i32
    %12 = arith.extui %11 : i1 to i32
    %c0_i32_9 = arith.constant 0 : i32
    %13 = arith.cmpi ne, %12, %c0_i32_9 : i32
    scf.if %13 {
      %c0_10 = arith.constant 0 : index
      %c0_11 = arith.constant 0 : index
      %14 = vector.load %arg7[%c0_10, %c0_11] : memref<16x384xf32, #tpu.memory_space<vmem>>, vector<16x384xf32>
      %c0_12 = arith.constant 0 : index
      %c0_13 = arith.constant 0 : index
      %15 = vector.load %arg5[%c0_12, %c0_13] : memref<1x384xf32, #tpu.memory_space<vmem>>, vector<1x384xf32>
      %16 = vector.broadcast %15 : vector<1x384xf32> to vector<16x384xf32>
      %17 = arith.addf %14, %16 : vector<16x384xf32>
      %c0_14 = arith.constant 0 : index
      %c0_15 = arith.constant 0 : index
      %18 = vector.load %arg6[%c0_14, %c0_15] : memref<16x384xf32, #tpu.memory_space<vmem>>, vector<16x384xf32>
      tpu.vector_store %arg6[%c0_14, %c0_15], %17 {strides = array<i32>} : memref<16x384xf32, #tpu.memory_space<vmem>>, vector<16x384xf32>,
    } else {
    }
    return
  }
  func.func @transform_0(%arg0: i32, %arg1: i32, %arg2: i32) -> (i32, i32) {
    %c0_i32 = arith.constant 0 : i32
    return %arg0, %arg2 : i32, i32
  }
  func.func @transform_1(%arg0: i32, %arg1: i32, %arg2: i32) -> (i32, i32) {
    %c0_i32 = arith.constant 0 : i32
    return %arg2, %arg1 : i32, i32
  }
  func.func @transform_2(%arg0: i32, %arg1: i32, %arg2: i32) -> (i32, i32) {
    %c0_i32 = arith.constant 0 : i32
    %c0_i32_0 = arith.constant 0 : i32
    return %c0_i32, %arg1 : i32, i32
  }
  func.func @transform_3(%arg0: i32, %arg1: i32, %arg2: i32) -> (i32, i32) {
    %c0_i32 = arith.constant 0 : i32
    return %arg0, %arg1 : i32, i32
  }
}

</mosaic_0001>

<bundles_post_ra>
// kernel: tpu_custom_call.1
= control target key start
LH: loop header
LB: loop body
LE: loop exit
PB: predicated region body
PF: predicated region fallthrough
CT: control target
= control target key end

     0   :  { %8 = vsyncpa [#allocation4], 0  ;;  %s482_s0 = inlined_call_operand.hbm [shape: f32[16,128], index: 0, kind: input, shape index: {}]   ;;  %s483_s1 = inlined_call_operand.hbm [shape: f32[128,384], index: 1, kind: input, shape index: {}]   ;;  %s484_s2 = inlined_call_operand.vmem [shape: f32[1,384], index: 2, kind: input, shape index: {}]   ;;  %s485_s3 = inlined_call_operand.hbm [shape: f32[16,384], index: 3, kind: output, shape index: {}]  }
   0x1   :  { %9 = vsyncpa [#allocation7], 0 }
   0x2   :  { %10 = vsyncpa [#allocation5], 0  ;;  %s398_s12 = smov [#allocation3]   ;;  %s326_s16 = scalar_lea.hbm %s482_s0, 256 }
   0x3   :  { %s16_s13 = sshll.u32 %s398_s12, 4  ;;  %p327_p0 = scmp.ne.s32.totalorder %s482_s0, %s326_s16  ;;  %s17_s13 = int_to_ptr.vmem [resolvable:$true] %s16_s13 }
   0x4   :  { %p330_p1 = scmp.lt.u32.totalorder %s326_s16, %s482_s0 }
   0x6   :  { %p332_p2 = pnand %p330_p1, %p327_p0 }
   0x8   :  { %335 = shalt.err (!%p332_p2)
}
   0x9   :  { %s336_s21 = scalar_lea.vmem %s17_s13, 256  ;;  %p341_p4 = scmp.lt.s32.totalorder %s17_s13, %s17_s13 }
   0xa   :  { %p337_p3 = scmp.ne.s32.totalorder %s17_s13, %s336_s21  ;;  %p342_p5 = scmp.lt.s32.totalorder %s336_s21, %s336_s21 }
   0xc   :  { %p343_p6 = por %p342_p5, %p341_p4 }
   0xe   :  { %p344_p7 = pnand %p343_p6, %p337_p3 }
  0x10   :  { %347 = shalt.err (!%p344_p7)
}
  0x11   :  { %s399_s22 = smov 128   ;;  %s400_s23 = smov 8  }
  0x12   :  { %22 = dma.hbm_to_vmem [thread:$0]  %s482_s0, 256, %s17_s13, [#allocation4], %s399_s22, %s399_s22, %s400_s23  }
  0x13   :  { %s401_s26 = smov [#allocation6]   ;;  %s348_s30 = scalar_lea.hbm %s483_s1, 6144 }
  0x14   :  { %s28_s27 = sshll.u32 %s401_s26, 4  ;;  %p349_p8 = scmp.ne.s32.totalorder %s483_s1, %s348_s30  ;;  %s29_s27 = int_to_ptr.vmem [resolvable:$true] %s28_s27 }
  0x15   :  { %p352_p9 = scmp.lt.u32.totalorder %s348_s30, %s483_s1 }
  0x17   :  { %p354_p10 = pnand %p352_p9, %p349_p8 }
  0x19   :  { %357 = shalt.err (!%p354_p10)
}
  0x1a   :  { %s358_s8 = scalar_lea.vmem %s29_s27, 6144  ;;  %p363_p12 = scmp.lt.s32.totalorder %s29_s27, %s29_s27 }
  0x1b   :  { %p359_p11 = scmp.ne.s32.totalorder %s29_s27, %s358_s8  ;;  %p364_p13 = scmp.lt.s32.totalorder %s358_s8, %s358_s8 }
  0x1d   :  { %p365_p0 = por %p364_p13, %p363_p12 }
  0x1f   :  { %p366_p1 = pnand %p365_p0, %p359_p11 }
  0x21   :  { %369 = shalt.err (!%p366_p1)
}
  0x22   :  { %s402_s0 = smov 384   ;;  %s403_s9 = smov 24  }
  0x23   :  { %34 = dma.hbm_to_vmem [thread:$0]  %s483_s1, 6144, %s29_s27, [#allocation7], %s402_s0, %s402_s0, %s403_s9  }
  0x24   :  { %392 = dma.done.wait [#allocation4], 256  }
  0x25   :  { %393 = vsyncadd [#allocation4], 4294967040 }
  0x26   :  { %394 = dma.done.wait [#allocation7], 6144  }
  0x27   :  { %395 = vsyncadd [#allocation7], 4294961152  ;;  %v404_v0 = vmov 0.0   ;;  %vm405_vm0 = vmmov 0   ;;  %v406_v1 = vmov 0   ;;  %v57_v2 = vld [vmem:[#allocation6 + $0x8] sm:$0xff] }
  0x28   :  { %296 = vmatprep.subr.bf16.mxu1 %v404_v0  ;;  %312 = vmatprep.mubr.msk.bf16.mxu1 %vm405_vm0, %v404_v0  ;;  %v60_v3 = vld [vmem:[#allocation6 + $0x20] sm:$0xff]  ;;  %v58_v4 = vld [vmem:[#allocation6 + $0x10] sm:$0xff]  ;;  %v61_v6 = vld [vmem:[#allocation6 + $0x28] sm:$0xff]  ;;  %s407_s13 = smov [#allocation8]  }
  0x29   :  { %167 = vmatprep.mubr.bf16.mxu0 %v406_v1  ;;  %v106_v5 = vpack.c.bf16 %v60_v3, %v57_v2  ;;  %v56_v7 = vld [vmem:[#allocation6] sm:$0xff]  ;;  %v59_v8 = vld [vmem:[#allocation6 + $0x18] sm:$0xff]  ;;  %v107_v9 = vpack.c.bf16 %v61_v6, %v58_v4  ;;  %v66_v12 = vld [vmem:[#allocation6 + $0x50] sm:$0xff]  ;;  %s274_s14 = sshll.u32 %s407_s13, 4  ;;  %s275_s14 = int_to_ptr.vmem [resolvable:$true] %s274_s14 }
  0x2a   :  { %v105_v10 = vpack.c.bf16 %v59_v8, %v56_v7  ;;  %v63_v11 = vld [vmem:[#allocation6 + $0x38] sm:$0xff]  ;;  %v64_v13 = vld [vmem:[#allocation6 + $0x40] sm:$0xff]  ;;  %v62_v16 = vld [vmem:[#allocation6 + $0x30] sm:$0xff]  ;;  %p375_p3 = scmp.lt.s32.totalorder %s275_s14, %s275_s14 }
  0x2b   :  { %135 = vmatprep.subr.bf16.mxu0 %v106_v5  ;;  %v109_v14 = vpack.c.bf16 %v66_v12, %v63_v11  ;;  %v67_v15 = vld [vmem:[#allocation6 + $0x58] sm:$0xff]  ;;  %v65_v17 = vld [vmem:[#allocation6 + $0x48] sm:$0xff]  ;;  %297 = vmatpush3.bf16.msra.mxu1 %v107_v9  ;;  %v72_v21 = vld [vmem:[#allocation6 + $0x80] sm:$0xff] }
  0x2c   :  { %136 = vmatpush1.bf16.msra.mxu0 %v105_v10  ;;  %v110_v18 = vpack.c.bf16 %v67_v15, %v64_v13  ;;  %v108_v19 = vpack.c.bf16 %v65_v17, %v62_v16  ;;  %v69_v20 = vld [vmem:[#allocation6 + $0x68] sm:$0xff]  ;;  %v70_v22 = vld [vmem:[#allocation6 + $0x70] sm:$0xff]  ;;  %298 = vmatprep.subr.bf16.mxu1 %v404_v0  ;;  %v68_v25 = vld [vmem:[#allocation6 + $0x60] sm:$0xff] }
  0x2d   :  { %137 = vmatprep.subr.bf16.mxu0 %v109_v14  ;;  %v112_v23 = vpack.c.bf16 %v72_v21, %v69_v20  ;;  %v73_v24 = vld [vmem:[#allocation6 + $0x88] sm:$0xff]  ;;  %v71_v26 = vld [vmem:[#allocation6 + $0x78] sm:$0xff]  ;;  %v78_v28 = vld [vmem:[#allocation6 + $0xb0] sm:$0xff]  ;;  %v242_v14 = vlaneseq }
  0x2e   :  { %v75_v27 = vld [vmem:[#allocation6 + $0x98] sm:$0xff]  ;;  %v113_v29 = vpack.c.bf16 %v73_v24, %v70_v22  ;;  %v111_v30 = vpack.c.bf16 %v71_v26, %v68_v25  ;;  %v76_v31 = vld [vmem:[#allocation6 + $0xa0] sm:$0xff]  ;;  %v74_v34 = vld [vmem:[#allocation6 + $0x90] sm:$0xff] }
  0x2f   :  { %299 = vmatpush3.bf16.msra.mxu1 %v110_v18  ;;  %v115_v32 = vpack.c.bf16 %v78_v28, %v75_v27  ;;  %v79_v33 = vld [vmem:[#allocation6 + $0xb8] sm:$0xff]  ;;  %v77_v35 = vld [vmem:[#allocation6 + $0xa8] sm:$0xff]  ;;  %v84_v37 = vld [vmem:[#allocation6 + $0xe0] sm:$0xff]  ;;  %v243_v15 = vshrl.u32 %v242_v14, 7 }
  0x30   :  { %138 = vmatpush1.bf16.msra.mxu0 %v108_v19  ;;  %300 = vmatprep.subr.bf16.mxu1 %v404_v0  ;;  %v81_v36 = vld [vmem:[#allocation6 + $0xc8] sm:$0xff]  ;;  %v116_v38 = vpack.c.bf16 %v79_v33, %v76_v31  ;;  %v114_v39 = vpack.c.bf16 %v77_v35, %v74_v34  ;;  %v82_v40 = vld [vmem:[#allocation6 + $0xd0] sm:$0xff]  ;;  %v80_v43 = vld [vmem:[#allocation6 + $0xc0] sm:$0xff] }
  0x31   :  { %139 = vmatprep.subr.bf16.mxu0 %v112_v23  ;;  %v118_v41 = vpack.c.bf16 %v84_v37, %v81_v36  ;;  %v85_v42 = vld [vmem:[#allocation6 + $0xe8] sm:$0xff]  ;;  %v83_v44 = vld [vmem:[#allocation6 + $0xd8] sm:$0xff]  ;;  %v90_v46 = vld [vmem:[#allocation6 + $0x110] sm:$0xff]  ;;  %v252_v16 = vsub.s32 2, %v243_v15  ;;  %v244_v17 = vsub.s32 0, %v243_v15  ;;  %v248_v19 = vsub.s32 1, %v243_v15 }
  0x32   :  { %v87_v45 = vld [vmem:[#allocation6 + $0xf8] sm:$0xff]  ;;  %v119_v47 = vpack.c.bf16 %v85_v42, %v82_v40  ;;  %v117_v48 = vpack.c.bf16 %v83_v44, %v80_v43  ;;  %v88_v49 = vld [vmem:[#allocation6 + $0x100] sm:$0xff]  ;;  %v86_v52 = vld [vmem:[#allocation6 + $0xf0] sm:$0xff] }
  0x33   :  { %301 = vmatpush3.bf16.msra.mxu1 %v113_v29  ;;  %v121_v50 = vpack.c.bf16 %v90_v46, %v87_v45  ;;  %v91_v51 = vld [vmem:[#allocation6 + $0x118] sm:$0xff]  ;;  %v89_v53 = vld [vmem:[#allocation6 + $0x108] sm:$0xff]  ;;  %v96_v55 = vld [vmem:[#allocation6 + $0x140] sm:$0xff] }
  0x34   :  { %140 = vmatpush1.bf16.msra.mxu0 %v111_v30  ;;  %302 = vmatprep.subr.bf16.mxu1 %v404_v0  ;;  %v93_v54 = vld [vmem:[#allocation6 + $0x128] sm:$0xff]  ;;  %v122_v56 = vpack.c.bf16 %v91_v51, %v88_v49  ;;  %v120_v57 = vpack.c.bf16 %v89_v53, %v86_v52  ;;  %v94_v58 = vld [vmem:[#allocation6 + $0x130] sm:$0xff]  ;;  %v92_v61 = vld [vmem:[#allocation6 + $0x120] sm:$0xff] }
  0x35   :  { %141 = vmatprep.subr.bf16.mxu0 %v115_v32  ;;  %v124_v59 = vpack.c.bf16 %v96_v55, %v93_v54  ;;  %v97_v60 = vld [vmem:[#allocation6 + $0x148] sm:$0xff]  ;;  %v95_v62 = vld [vmem:[#allocation6 + $0x138] sm:$0xff]  ;;  %v102_v1 = vld [vmem:[#allocation6 + $0x170] sm:$0xff] }
  0x36   :  { %v99_v63 = vld [vmem:[#allocation6 + $0x158] sm:$0xff]  ;;  %v125_v2 = vpack.c.bf16 %v97_v60, %v94_v58  ;;  %v123_v3 = vpack.c.bf16 %v95_v62, %v92_v61  ;;  %v100_v4 = vld [vmem:[#allocation6 + $0x160] sm:$0xff]  ;;  %v98_v7 = vld [vmem:[#allocation6 + $0x150] sm:$0xff] }
  0x37   :  { %303 = vmatpush3.bf16.msra.mxu1 %v116_v38  ;;  %v127_v5 = vpack.c.bf16 %v102_v1, %v99_v63  ;;  %v103_v6 = vld [vmem:[#allocation6 + $0x178] sm:$0xff]  ;;  %v101_v8 = vld [vmem:[#allocation6 + $0x168] sm:$0xff]  ;;  %v54_v11 = vld [vmem:[#allocation3] sm:$0xff] }
  0x38   :  { %142 = vmatpush1.bf16.msra.mxu0 %v114_v39  ;;  %304 = vmatprep.subr.bf16.mxu1 %v404_v0  ;;  %v128_v9 = vpack.c.bf16 %v103_v6, %v100_v4  ;;  %v126_v10 = vpack.c.bf16 %v101_v8, %v98_v7  ;;  %v55_v12 = vld [vmem:[#allocation3 + $0x8] sm:$0xff]  ;;  %v240_v18 = vld [vmem:[%s484_s2] sm:$0x7]  ;;  %s370_s2 = scalar_lea.vmem %s275_s14, 768 }
  0x39   :  { %143 = vmatprep.subr.bf16.mxu0 %v118_v41  ;;  %v104_v13 = vpack.c.bf16 %v55_v12, %v54_v11  ;;  %v253_v20 = vrot.slane %v240_v18, %v252_v16  ;;  %v245_v21 = vrot.slane %v240_v18, %v244_v17  ;;  %v249_v22 = vrot.slane %v240_v18, %v248_v19  ;;  %p371_p2 = scmp.ne.s32.totalorder %s275_s14, %s370_s2  ;;  %p376_p4 = scmp.lt.s32.totalorder %s370_s2, %s370_s2 }
  0x3b   :  { %305 = vmatpush3.bf16.msra.mxu1 %v119_v47  ;;  %p377_p5 = por %p376_p4, %p375_p3 }
  0x3c   :  { %144 = vmatpush1.bf16.msra.mxu0 %v117_v48  ;;  %306 = vmatprep.subr.bf16.mxu1 %v404_v0 }
  0x3d   :  { %145 = vmatprep.subr.bf16.mxu0 %v121_v50  ;;  %p378_p6 = pnand %p377_p5, %p371_p2 }
  0x3f   :  { %307 = vmatpush3.bf16.msra.mxu1 %v122_v56 }
  0x40   :  { %146 = vmatpush1.bf16.msra.mxu0 %v120_v57  ;;  %308 = vmatprep.subr.bf16.mxu1 %v404_v0 }
  0x41   :  { %147 = vmatprep.subr.bf16.mxu0 %v124_v59 }
  0x43   :  { %309 = vmatpush3.bf16.msra.mxu1 %v125_v2 }
  0x44   :  { %148 = vmatpush1.bf16.msra.mxu0 %v123_v3  ;;  %310 = vmatprep.subr.bf16.mxu1 %v404_v0 }
  0x45   :  { %149 = vmatprep.subr.bf16.mxu0 %v127_v5 }
  0x47   :  { %311 = vmatpush3.bf16.msra.mxu1 %v128_v9 }
  0x48   :  { %150 = vmatpush1.bf16.msra.mxu0 %v126_v10 }
  0x4a   :  { %313 = vmatmul.mubr.bf16.vlgmr.msra.gmra.mrb[0].mxu1 %v104_v13 }
  0x4b   :  { %168 = vmatmul.mubr.bf16.vlgmr.msra.gmra.mrb[0].mxu0 %v104_v13 }
 0x11d   :  { %v212_v23 = vpop.f32.mrb[0].mxu1 }
 0x11e   :  { %v169_v0 = vpop.f32.mrb[0].mxu0  ;;  %v259_v24 = vadd.f32 %v253_v20, %v212_v23  ;;  %v314_v26 = vpop.f32.mrb[1].mxu1 }
 0x11f   :  { %v257_v25 = vadd.f32 %v245_v21, %v169_v0  ;;  %v171_v27 = vpop.f32.mrb[1].mxu0  ;;  %v215_v29 = vpop.f32.mrb[2].mxu1 }
 0x120   :  { %v258_v28 = vadd.f32 %v249_v22, %v171_v27  ;;  %v173_v30 = vpop.f32.mrb[2].mxu0  ;;  %265 = vst [vmem:[#allocation8 + $0x10] sm:$0xff] %v259_v24  ;;  %v262_v31 = vadd.f32 %v253_v20, %v215_v29  ;;  %v315_v33 = vpop.f32.mrb[3].mxu1 }
 0x121   :  { %263 = vst [vmem:[#allocation8] sm:$0xff] %v257_v25  ;;  %v260_v32 = vadd.f32 %v245_v21, %v173_v30  ;;  %v175_v34 = vpop.f32.mrb[3].mxu0 }
 0x122   :  { %264 = vst [vmem:[#allocation8 + $0x8] sm:$0xff] %v258_v28  ;;  %v261_v35 = vadd.f32 %v249_v22, %v175_v34  ;;  %268 = vst [vmem:[#allocation8 + $0x28] sm:$0xff] %v262_v31 }
 0x123   :  { %266 = vst [vmem:[#allocation8 + $0x18] sm:$0xff] %v260_v32 }
 0x124   :  { %267 = vst [vmem:[#allocation8 + $0x20] sm:$0xff] %v261_v35 }
 0x125   :  { %381 = shalt.err (!%p378_p6)
}
 0x126   :  { %s382_s17 = scalar_lea.hbm %s485_s3, 768 }
 0x127   :  { %p383_p7 = scmp.ne.s32.totalorder %s485_s3, %s382_s17  ;;  %p386_p8 = scmp.lt.u32.totalorder %s382_s17, %s485_s3 }
 0x129   :  { %p388_p9 = pnand %p386_p8, %p383_p7 }
 0x12b   :  { %391 = shalt.err (!%p388_p9)
}
 0x12c   :  { %280 = dma.vmem_to_hbm [thread:$0]  %s275_s14, 768, %s485_s3, [#allocation5], %s402_s0, %s402_s0, %s403_s9  }
 0x12d   :  { %396 = dma.done.wait [#allocation5], 768  }
 0x12e   :  { %397 = vsyncadd [#allocation5], 4294966528 }
 0x12f   :  { %284 = vsyncpa [#allocation4], 1 }
 0x130   :  { %285 = vsyncpa [#allocation7], 1 }
 0x131   :  { %286 = vsyncpa [#allocation5], 1 }

</bundles_post_ra>
